<compile_context>
chip_gen: v7x
topology: tpu7x:2x2x1
jax: 0.10.0
libtpu: 0.0.40
codegen_flags: <defaults>
</compile_context>

<pallas_src>
import jax
import jax.numpy as jnp
from jax.experimental import pallas as pl
from jax.experimental.pallas import tpu as pltpu

_MIB = 1024 * 1024


def _l1_kernel(x_ref, y_ref, o_ref):
    # Dtype promotion on the VPU (free; this kernel is HBM-bound), then pure
    # elementwise |x - y| on the current VMEM tile.
    x = x_ref[...].astype(o_ref.dtype)
    y = y_ref[...].astype(o_ref.dtype)
    o_ref[...] = jnp.abs(x - y)


def _vmem_capacity_bytes():
    """Per-core VMEM capacity; conservative (v7x-sized) default if unknown."""
    try:
        cap = int(pltpu.get_tpu_info().vmem_capacity_bytes)
        if cap > 0:
            return cap
    except Exception:
        pass
    return 64 * _MIB


def _divisors(m):
    out = set()
    i = 1
    while i * i <= m:
        if m % i == 0:
            out.add(i)
            out.add(m // i)
        i += 1
    return sorted(out)


def _choose_tile_rows(rows_total, sublane, max_rows_budget):
    """Pick a tile row count under the VMEM byte budget.

    For small grids, prefer a tile that exactly divides rows_total (no ragged
    trailing block -> unmasked stores) with an EVEN number of grid steps so
    both v7x TensorCores get balanced work.  For large grids just take the
    biggest budget-fitting tile (per-step overhead already amortized).
    """
    if rows_total <= sublane:
        return rows_total  # single block == full array dim (always legal)
    max_rows = min(rows_total, max_rows_budget)
    max_rows = max(sublane, (max_rows // sublane) * sublane)
    steps = pl.cdiv(rows_total, max_rows)
    if steps >= 8:
        # Many steps: odd counts / one partial trailing block are negligible.
        return max_rows
    divs = [d for d in _divisors(rows_total) if d % sublane == 0 and d <= max_rows]
    for want_even in (True, False):
        best = None
        for d in divs:
            s = rows_total // d
            if want_even and (s % 2 != 0):
                continue
            if best is None or d > best:
                best = d
        if best is not None:
            return best
    # No exact divisor fits: keep the budget tile, nudging a small odd step
    # count to an even one.
    if steps % 2 == 1 and rows_total > max_rows:
        steps += 1
    tr = pl.cdiv(rows_total, steps)
    tr = pl.cdiv(tr, sublane) * sublane
    return min(max(tr, sublane), max_rows)


def l1_loss(x, y, *, min_pallas_bytes=2 * _MIB):
    """Elementwise |x - y| with the same shape/dtype semantics as the module."""
    assert x.shape == y.shape, "x and y must have identical shapes"
    out_dtype = jnp.result_type(x.dtype, y.dtype)
    orig_shape = x.shape
    n = x.size

    itemsizes = (
        jnp.dtype(x.dtype).itemsize,
        jnp.dtype(y.dtype).itemsize,
        jnp.dtype(out_dtype).itemsize,
    )
    max_itemsize = max(itemsizes)

    # Widest lane-dense width (multiple of 128) that divides n exactly, so the
    # 2D reshape is a free, layout-preserving view and stores are unmasked.
    # (Holds for row-major-contiguous inputs; a non-default layout would make
    # XLA insert a copy, which is a perf note, not a correctness issue.)
    lanes = None
    for w in (4096, 2048, 1024, 512, 256, 128):
        if n > 0 and n % w == 0:
            lanes = w
            break

    # XLA fallback for tiny / ragged inputs: padding + slicing around a
    # pallas_call would add extra full HBM passes, and for small tensors the
    # launch/step overhead dominates.  Plain jnp.abs(x - y) fuses optimally.
    if lanes is None or n * max_itemsize < min_pallas_bytes:
        return jnp.abs(x - y)

    rows_total = n // lanes
    xf = x.reshape(rows_total, lanes)
    yf = y.reshape(rows_total, lanes)

    # Native sublane packing of the narrowest dtype: 8 rows for 4-byte,
    # 16 for 2-byte, 32 for 1-byte elements.
    sublane = max(8, 32 // min(itemsizes))

    # Generation-aware tile budget: per-input block ~= VMEM/8; 3 arrays x 2
    # pipeline buffers stay at ~3/4 of VMEM, vmem_limit_bytes leaves headroom
    # for compiler-internal scratch (and sits above v5e's 16 MiB scoped default).
    vmem_cap = _vmem_capacity_bytes()
    target_tile_bytes = max(2 * _MIB, vmem_cap // 8)
    vmem_limit = int(min(vmem_cap - 8 * _MIB, 6 * target_tile_bytes + 8 * _MIB))

    max_rows_budget = max(sublane, target_tile_bytes // (lanes * max_itemsize))
    tile_rows = _choose_tile_rows(rows_total, sublane, max_rows_budget)
    grid = (pl.cdiv(rows_total, tile_rows),)

    # If profiling ever shows exposed input DMA on v7x at this tile size, the
    # next lever is pipeline_mode=pl.Buffered(3) on the input BlockSpecs
    # (adopt only if the xprof trace shows the input DMA on the critical path).
    out2d = pl.pallas_call(
        _l1_kernel,
        out_shape=jax.ShapeDtypeStruct((rows_total, lanes), out_dtype),
        grid_spec=pltpu.PrefetchScalarGridSpec(
            num_scalar_prefetch=0,
            grid=grid,
            in_specs=[
                pl.BlockSpec((tile_rows, lanes), lambda i: (i, 0)),
                pl.BlockSpec((tile_rows, lanes), lambda i: (i, 0)),
            ],
            out_specs=pl.BlockSpec((tile_rows, lanes), lambda i: (i, 0)),
        ),
        compiler_params=pltpu.CompilerParams(
            dimension_semantics=("parallel",),
            vmem_limit_bytes=vmem_limit,
        ),
        cost_estimate=pl.CostEstimate(
            flops=2 * n,
            transcendentals=0,
            bytes_accessed=n * sum(itemsizes),
        ),
    )(xf, yf)

    return out2d.reshape(orig_shape)


if __name__ == "__main__":
    key = jax.random.PRNGKey(0)
    k1, k2, k3, k4, k5, k6 = jax.random.split(key, 6)

    # 1) Module-sized small NCHW input: tiny -> takes the XLA fallback path.
    x = jax.random.normal(k1, (2, 4, 16, 16), dtype=jnp.float32)
    y = jax.random.normal(k2, (2, 4, 16, 16), dtype=jnp.float32)
    out = jax.block_until_ready(l1_loss(x, y))
    ref = jnp.abs(x - y)
    assert out.shape == ref.shape and out.dtype == ref.dtype
    assert jnp.allclose(out, ref, atol=1e-6), "mismatch vs reference (small f32)"

    # 2) Lane-aligned f32 input routed through the Pallas kernel
    #    (min_pallas_bytes=0 forces the Pallas path at this small test size).
    xa = jax.random.normal(k3, (8, 4, 64, 128), dtype=jnp.float32)
    ya = jax.random.normal(k4, (8, 4, 64, 128), dtype=jnp.float32)
    outa = jax.block_until_ready(l1_loss(xa, ya, min_pallas_bytes=0))
    refa = jnp.abs(xa - ya)
    assert outa.shape == refa.shape and outa.dtype == refa.dtype
    assert jnp.allclose(outa, refa, atol=1e-6), "mismatch vs reference (f32)"

    # 3) Mixed bf16/f32 input: promotion happens on the VPU inside the kernel,
    #    with a ragged trailing row-block (100 rows, tile 64).
    xb = jax.random.normal(k5, (4, 8, 100, 128), dtype=jnp.bfloat16)
    yb = jax.random.normal(k6, (4, 8, 100, 128), dtype=jnp.float32)
    outb = jax.block_until_ready(l1_loss(xb, yb, min_pallas_bytes=0))
    refb = jnp.abs(xb - yb)
    assert outb.shape == refb.shape and outb.dtype == refb.dtype
    assert jnp.allclose(outb, refb, atol=1e-2), "mismatch vs reference (mixed)"

    print("KERNEL_OK")
</pallas_src>

<mosaic_0001>
module attributes {stable_mosaic.version = 11 : i64} {
  func.func @_l1_kernel(%arg0: i32, %arg1: memref<32x4096xf32, #tpu.memory_space<vmem>>, %arg2: memref<32x4096xf32, #tpu.memory_space<vmem>>, %arg3: memref<32x4096xf32, #tpu.memory_space<vmem>>) attributes {dimension_semantics = [#tpu.dimension_semantics<parallel>], iteration_bounds = array<i64: 2>, scalar_prefetch = 0 : i64, scratch_operands = 0 : i64, tpu.core_type = #tpu.core_type<tc>, window_params = [{transform_indices = @transform_0, window_bounds = array<i64: 32, 4096>}, {transform_indices = @transform_1, window_bounds = array<i64: 32, 4096>}, {transform_indices = @transform_2, window_bounds = array<i64: 32, 4096>}]} {
    %c0 = arith.constant 0 : index
    %c0_0 = arith.constant 0 : index
    %0 = vector.load %arg1[%c0, %c0_0] : memref<32x4096xf32, #tpu.memory_space<vmem>>, vector<32x4096xf32>
    %c0_1 = arith.constant 0 : index
    %c0_2 = arith.constant 0 : index
    %1 = vector.load %arg2[%c0_1, %c0_2] : memref<32x4096xf32, #tpu.memory_space<vmem>>, vector<32x4096xf32>
    %2 = arith.subf %0, %1 : vector<32x4096xf32>
    %3 = math.absf %2 : vector<32x4096xf32>
    %c0_3 = arith.constant 0 : index
    %c0_4 = arith.constant 0 : index
    %4 = vector.load %arg3[%c0_3, %c0_4] : memref<32x4096xf32, #tpu.memory_space<vmem>>, vector<32x4096xf32>
    tpu.vector_store %arg3[%c0_3, %c0_4], %3 {strides = array<i32>} : memref<32x4096xf32, #tpu.memory_space<vmem>>, vector<32x4096xf32>,
    return
  }
  func.func @transform_0(%arg0: i32) -> (i32, i32) {
    %c0_i32 = arith.constant 0 : i32
    %c0_i32_0 = arith.constant 0 : i32
    return %arg0, %c0_i32 : i32, i32
  }
  func.func @transform_1(%arg0: i32) -> (i32, i32) {
    %c0_i32 = arith.constant 0 : i32
    %c0_i32_0 = arith.constant 0 : i32
    return %arg0, %c0_i32 : i32, i32
  }
  func.func @transform_2(%arg0: i32) -> (i32, i32) {
    %c0_i32 = arith.constant 0 : i32
    %c0_i32_0 = arith.constant 0 : i32
    return %arg0, %c0_i32 : i32, i32
  }
}

</mosaic_0001>

<bundles_post_ra>
// kernel: tpu_custom_call.1
= control target key start
LH: loop header
LB: loop body
LE: loop exit
PB: predicated region body
PF: predicated region fallthrough
CT: control target
= control target key end

     0   :  { %7 = vsyncpa [#allocation3], 0  ;;  %s1813_s0 = inlined_call_operand.hbm [shape: f32[64,4096], index: 0, kind: input, shape index: {}]   ;;  %s1814_s1 = inlined_call_operand.hbm [shape: f32[64,4096], index: 1, kind: input, shape index: {}]   ;;  %s1815_s2 = inlined_call_operand.hbm [shape: f32[64,4096], index: 2, kind: output, shape index: {}]  }
   0x1   :  { %9 = vsyncpa [#allocation3 + $0x1], 0 }
   0x2   :  { %10 = vsyncpa [#allocation6], 0 }
   0x3   :  { %12 = vsyncpa [#allocation6 + $0x1], 0 }
   0x4   :  { %13 = vsyncpa [#allocation4], 0 }
   0x5   :  { %15 = vsyncpa [#allocation4 + $0x1], 0  ;;  %s1194_s9 = smov 0   ;;  %s1196_s10 = smov 0  }
   0x6   :  { %s1198_s11 = smov 0   ;;  %s1200_s12 = smov 0  }
   0x7 LB: > { %s1215_s13 = sadd.s32 4294967295, %s1170_s12   ;;  %s958_s14 = sadd.s32 4294967294, %s1170_s12   ;;  %s1170_s12 = sphi %s1200_s12, %s1831_s12   ;;  %s1166_s11 = sphi %s1198_s11, %s1830_s11   ;;  %s1162_s10 = sphi %s1196_s10, %s1829_s10   ;;  %s1158_s9 = sphi %s1194_s9, %s1828_s9  }
   0x8   : > { %s1219_s15 = sadd.s32 1, %s1170_s12   ;;  %s28_s16 = sadd.s32 1, %s1166_s11 }
   0x9   : > { %s25_s17 = ssub.s32 %s1170_s12, %s1219_s15  ;;  %p35_p0 = scmp.ne.s32.totalorder %s1166_s11, %s1162_s10 }
   0xa   : > { %p26_p1 = scmp.eq.s32.totalorder %s25_s17, 0  ;;  %p36_p2 = scmp.eq.s32.totalorder %s1170_s12, 0 }
   0xb   : > { %p41_p3 = scmp.ne.s32.totalorder %s1162_s10, %s1158_s9  ;;  %p42_p4 = scmp.eq.s32.totalorder %s1215_s13, 0 }
   0xc   : > { %s1231_s18 = scalar_select %p26_p1, %s1166_s11, %s28_s16  }
   0xd   : > { %p1233_p5 = por %p36_p2, %p35_p0  ;;  %p1237_p6 = por %p42_p4, %p41_p3 }
   0xe   : > { %p91_p7 = scmp.eq.s32.totalorder %s1215_s13, 1  ;;  %p97_p8 = scmp.eq.s32.totalorder %s958_s14, 1 }
   0xf   : > { %s1819_s20 = scalar_select %p1237_p6, 1, 0 }
  0x10   : > { %p1002_p10 = scmp.lt.s32.totalorder %s1170_s12, 2  ;;  %p1244_p11 = por %p91_p7, %p35_p0 }
  0x11   : > { %p1248_p12 = por %p97_p8, %p41_p3  ;;  %s1253_s23 = sand.u32 1, %s1166_s11  }
  0x12   : > { %s1820_s21 = scalar_select %p1244_p11, 1, 0 }
  0x13   : > { %s1821_s22 = scalar_select %p1248_p12, 1, 0 }
  0x14   : > { %s980_s24 = sshll.u32 %s1170_s12, 14  ;;  %s961_s25 = sshll.u32 %s1253_s23, 10 }
  0x15   : > { %s1262_s28 = scalar_lea.hbm %s1813_s0, %s980_s24  ;;  %s121_s29 = scalar_lea.vmem [#allocation2], %s961_s25 }
  0x16   : > { %s129_s30 = sshll.u32 %s121_s29, 4  ;;  %p1268_p13 = pnand %p1002_p10, %p1233_p5  ;;  %s1272_s30 = int_to_ptr.vmem [resolvable:$true] %s129_s30 }
  0x17   : > { %s118_s4 = scalar_lea.sflag [#allocation3], %s1253_s23  ;;  %s1040_s5 = scalar_lea.hbm %s1262_s28, 16384 }
  0x18   : > { %p1041_p0 = scmp.ne.s32.totalorder %s1262_s28, %s1040_s5  ;;  %p1042_p1 = pneg %p1268_p13 }
  0x19   : > { %s1045_s8 = scalar_lea.hbm %s1813_s0, 32768  ;;  %p1046_p4 = scmp.lt.u32.totalorder %s1262_s28, %s1813_s0 }
  0x1a   : > { %p1043_p2 = pnand %p1042_p1, %p1041_p0  ;;  %p1047_p5 = scmp.lt.u32.totalorder %s1045_s8, %s1040_s5 }
  0x1b   : > { %p1049_p8 = scmp.lt.u32.totalorder %s1040_s5, %s1262_s28 }
  0x1c   : > { %p1044_p3 = pneg %p1043_p2  ;;  %p1048_p7 = por %p1047_p5, %p1046_p4 }
  0x1e   : > { %p1050_p10 = por %p1049_p8, %p1048_p7 }
  0x20   : > { %p1051_p9 = pnand %p1050_p10, %p1044_p3 }
  0x22   : > { %1054 = shalt.err (!%p1051_p9)
}
  0x23   : > { %s1055_s17 = scalar_lea.vmem %s1272_s30, 16384  ;;  %s1172_s19 = smov [#allocation2]  }
  0x24   : > { %p1056_p0 = scmp.ne.s32.totalorder %s1272_s30, %s1055_s17  ;;  %s1060_s26 = sshll.u32 %s1172_s19, 4  ;;  %s1061_s26 = int_to_ptr.vmem [resolvable:$false] %s1060_s26 }
  0x25   : > { %s1062_s27 = scalar_lea.vmem %s1061_s26, 32768  ;;  %p1063_p11 = scmp.lt.s32.totalorder %s1272_s30, %s1061_s26 }
  0x26   : > { %p1058_p2 = pnand %p1056_p0, %p1042_p1  ;;  %p1064_p4 = scmp.lt.s32.totalorder %s1062_s27, %s1055_s17 }
  0x28   : > { %p1059_p12 = pneg %p1058_p2  ;;  %p1065_p5 = por %p1064_p4, %p1063_p11 }
  0x2a   : > { %p1066_p7 = pnand %p1065_p5, %p1059_p12 }
  0x2c   : > { %1069 = shalt.err (!%p1066_p7)
}
  0x2d   : > { %s1173_s29 = smov 4096   ;;  %s1174_s5 = smov 256  }
  0x2e   : > { %994 = dma.hbm_to_vmem [thread:$0]  (!%p1268_p13), %s1262_s28, 16384, %s1272_s30, %s118_s4, %s1173_s29, %s1173_s29, %s1174_s5  }
  0x2f   : > { %p969_p9 = scmp.ge.s32.totalorder %s1170_s12, 1  ;;  %p159_p11 = scmp.lt.s32.totalorder %s1170_s12, 3 }
  0x30   : > { %s1316_s14 = scalar_lea.hbm %s1814_s1, %s980_s24  ;;  %s143_s16 = scalar_lea.vmem [#allocation5], %s961_s25 }
  0x31   : > { %p1307_p12 = pnand %p969_p9, %p159_p11  ;;  %s151_s17 = sshll.u32 %s143_s16, 4  ;;  %s1320_s17 = int_to_ptr.vmem [resolvable:$true] %s151_s17 }
  0x32   : > { %s140_s28 = scalar_lea.sflag [#allocation6], %s1253_s23  ;;  %s1070_s30 = scalar_lea.hbm %s1316_s14, 16384 }
  0x33   : > { %p1071_p3 = scmp.ne.s32.totalorder %s1316_s14, %s1070_s30  ;;  %s1075_s24 = scalar_lea.hbm %s1814_s1, 32768 }
  0x34   : > { %p1076_p0 = scmp.lt.u32.totalorder %s1316_s14, %s1814_s1  ;;  %p1077_p2 = scmp.lt.u32.totalorder %s1075_s24, %s1070_s30 }
  0x35   : > { %p1073_p8 = pnand %p1071_p3, %p1042_p1  ;;  %p1079_p5 = scmp.lt.u32.totalorder %s1070_s30, %s1316_s14 }
  0x36   : > { %p1078_p4 = por %p1077_p2, %p1076_p0 }
  0x37   : > { %p1074_p10 = pneg %p1073_p8 }
  0x38   : > { %p1080_p7 = por %p1079_p5, %p1078_p4 }
  0x3a   : > { %p1081_p9 = pnand %p1080_p7, %p1074_p10 }
  0x3c   : > { %1084 = shalt.err (!%p1081_p9)
}
  0x3d   : > { %s1085_s25 = scalar_lea.vmem %s1320_s17, 16384  ;;  %s1175_s7 = smov [#allocation5]  }
  0x3e   : > { %p1086_p11 = scmp.ne.s32.totalorder %s1320_s17, %s1085_s25  ;;  %s1090_s8 = sshll.u32 %s1175_s7, 4  ;;  %s1091_s8 = int_to_ptr.vmem [resolvable:$false] %s1090_s8 }
  0x3f   : > { %s1092_s16 = scalar_lea.vmem %s1091_s8, 32768  ;;  %p1093_p6 = scmp.lt.s32.totalorder %s1320_s17, %s1091_s8 }
  0x40   : > { %p1088_p3 = pnand %p1086_p11, %p1042_p1  ;;  %p1094_p0 = scmp.lt.s32.totalorder %s1092_s16, %s1085_s25 }
  0x42   : > { %p1089_p8 = pneg %p1088_p3  ;;  %p1095_p2 = por %p1094_p0, %p1093_p6 }
  0x44   : > { %p1096_p4 = pnand %p1095_p2, %p1089_p8 }
  0x46   : > { %1099 = shalt.err (!%p1096_p4)
}
  0x47   : > { %997 = dma.hbm_to_vmem [thread:$0]  (!%p1268_p13), %s1316_s14, 16384, %s1320_s17, %s140_s28, %s1173_s29, %s1173_s29, %s1174_s5  }
  0x48   : > { %163 = sbr.rel (%p1307_p12) target bundleno = 213 (0xd5), region = 28  ;;  %s1354_s30 = sand.u32 (!%p1307_p12), 1, %s1162_s10  }
  0x49   : > { %s1357_s4 = sshll.u32 (!%p1307_p12), %s1354_s30, 10  ;;  %s166_s3 = scalar_lea.sflag (!%p1307_p12), [#allocation3], %s1354_s30 }
  0x4a   : > { %s1361_s19 = scalar_lea.vmem (!%p1307_p12), [#allocation2], %s1357_s4  ;;  %p1824_p6 = scmp.ne.s32.totalorder (!%p1307_p12), %s1819_s20, 0 }
  0x4f   : > { %1145 = dma.done.wait (%p1824_p6), %s166_s3, 16384  }
  0x50   : > { %1147 = vsyncadd (%p1824_p6), %s166_s3, 4294950912  ;;  %s175_s23 = scalar_lea.sflag [#allocation6], %s1354_s30  ;;  %s1369_s29 = scalar_lea.vmem [#allocation5], %s1357_s4 }
  0x51   : > { %1149 = dma.done.wait (%p1824_p6), %s175_s23, 16384  }
  0x52   : > { %1151 = vsyncadd (%p1824_p6), %s175_s23, 4294950912  ;;  %v207_v0 = vld [vmem:[%s1361_s19] sm:$0xff]  ;;  %v208_v2 = vld [vmem:[%s1361_s19 + $0x8] sm:$0xff]  ;;  %s1390_s20 = scalar_lea.vmem [#allocation7], %s1357_s4  ;;  %s984_s5 = sshll.u32 %s1215_s13, 14 }
  0x53   : > { %v335_v1 = vld [vmem:[%s1369_s29] sm:$0xff]  ;;  %v336_v4 = vld [vmem:[%s1369_s29 + $0x8] sm:$0xff]  ;;  %v209_v5 = vld [vmem:[%s1361_s19 + $0x10] sm:$0xff]  ;;  %s862_s6 = sshll.u32 %s1390_s20, 4  ;;  %s1763_s17 = scalar_lea.hbm %s1815_s2, %s984_s5  ;;  %s1765_s6 = int_to_ptr.vmem [resolvable:$true] %s862_s6 }
  0x54   : > { %v463_v3 = vsub.f32 %v207_v0, %v335_v1  ;;  %v337_v6 = vld [vmem:[%s1369_s29 + $0x10] sm:$0xff]  ;;  %v464_v7 = vsub.f32 %v208_v2, %v336_v4  ;;  %v210_v9 = vld [vmem:[%s1361_s19 + $0x18] sm:$0xff]  ;;  %v211_v11 = vld [vmem:[%s1361_s19 + $0x20] sm:$0xff]  ;;  %s848_s28 = scalar_lea.sflag [#allocation4], %s1354_s30  ;;  %s1100_s24 = scalar_lea.vmem %s1765_s6, 16384 }
  0x55   : > { %v465_v8 = vsub.f32 %v209_v5, %v337_v6  ;;  %v338_v10 = vld [vmem:[%s1369_s29 + $0x18] sm:$0xff]  ;;  %v339_v14 = vld [vmem:[%s1369_s29 + $0x20] sm:$0xff]  ;;  %v212_v15 = vld [vmem:[%s1361_s19 + $0x28] sm:$0xff]  ;;  %p1101_p13 = scmp.ne.s32.totalorder %s1765_s6, %s1100_s24  ;;  %p1825_p1 = scmp.ne.s32.totalorder %s1820_s21, 0 }
  0x56   : > { %v591_v12 = vand.u32 2147483647, %v463_v3  ;;  %v466_v13 = vsub.f32 %v210_v9, %v338_v10  ;;  %v340_v16 = vld [vmem:[%s1369_s29 + $0x28] sm:$0xff]  ;;  %v592_v17 = vand.u32 2147483647, %v464_v7  ;;  %v467_v19 = vsub.f32 %v211_v11, %v339_v14  ;;  %v213_v21 = vld [vmem:[%s1361_s19 + $0x30] sm:$0xff] }
  0x57   : > { %v593_v18 = vand.u32 2147483647, %v465_v8  ;;  %v468_v20 = vsub.f32 %v212_v15, %v340_v16  ;;  %v341_v22 = vld [vmem:[%s1369_s29 + $0x30] sm:$0xff]  ;;  %v214_v25 = vld [vmem:[%s1361_s19 + $0x38] sm:$0xff]  ;;  %v215_v27 = vld [vmem:[%s1361_s19 + $0x40] sm:$0xff]  ;;  %p1102_p12 = pnand %p1101_p13, %p1825_p1  ;;  %s1176_s26 = smov [#allocation7]  }
  0x58   : > { %719 = vst [vmem:[%s1390_s20] sm:$0xff] %v591_v12  ;;  %v594_v23 = vand.u32 2147483647, %v466_v13  ;;  %v469_v24 = vsub.f32 %v213_v21, %v341_v22  ;;  %v342_v26 = vld [vmem:[%s1369_s29 + $0x38] sm:$0xff]  ;;  %720 = vst [vmem:[%s1390_s20 + $0x8] sm:$0xff] %v592_v17  ;;  %v595_v28 = vand.u32 2147483647, %v467_v19 }
  0x59   : > { %721 = vst [vmem:[%s1390_s20 + $0x10] sm:$0xff] %v593_v18  ;;  %v596_v29 = vand.u32 2147483647, %v468_v20  ;;  %v470_v30 = vsub.f32 %v214_v25, %v342_v26  ;;  %v343_v31 = vld [vmem:[%s1369_s29 + $0x40] sm:$0xff]  ;;  %v216_v32 = vld [vmem:[%s1361_s19 + $0x48] sm:$0xff]  ;;  %v217_v36 = vld [vmem:[%s1361_s19 + $0x50] sm:$0xff]  ;;  %p1103_p10 = pneg %p1102_p12 }
  0x5a   : > { %722 = vst [vmem:[%s1390_s20 + $0x18] sm:$0xff] %v594_v23  ;;  %v597_v33 = vand.u32 2147483647, %v469_v24  ;;  %v471_v34 = vsub.f32 %v215_v27, %v343_v31  ;;  %v344_v35 = vld [vmem:[%s1369_s29 + $0x48] sm:$0xff]  ;;  %v345_v37 = vld [vmem:[%s1369_s29 + $0x50] sm:$0xff]  ;;  %723 = vst [vmem:[%s1390_s20 + $0x20] sm:$0xff] %v595_v28 }
  0x5b   : > { %724 = vst [vmem:[%s1390_s20 + $0x28] sm:$0xff] %v596_v29  ;;  %v598_v38 = vand.u32 2147483647, %v470_v30  ;;  %v472_v39 = vsub.f32 %v216_v32, %v344_v35  ;;  %v473_v40 = vsub.f32 %v217_v36, %v345_v37  ;;  %v218_v41 = vld [vmem:[%s1361_s19 + $0x58] sm:$0xff]  ;;  %v219_v43 = vld [vmem:[%s1361_s19 + $0x60] sm:$0xff]  ;;  %v220_v47 = vld [vmem:[%s1361_s19 + $0x68] sm:$0xff] }
  0x5c   : > { %v346_v42 = vld [vmem:[%s1369_s29 + $0x58] sm:$0xff]  ;;  %725 = vst [vmem:[%s1390_s20 + $0x30] sm:$0xff] %v597_v33  ;;  %v599_v44 = vand.u32 2147483647, %v471_v34  ;;  %v347_v46 = vld [vmem:[%s1369_s29 + $0x60] sm:$0xff]  ;;  %v348_v48 = vld [vmem:[%s1369_s29 + $0x68] sm:$0xff] }
  0x5d   : > { %v474_v45 = vsub.f32 %v218_v41, %v346_v42  ;;  %726 = vst [vmem:[%s1390_s20 + $0x38] sm:$0xff] %v598_v38  ;;  %v600_v49 = vand.u32 2147483647, %v472_v39  ;;  %v601_v50 = vand.u32 2147483647, %v473_v40  ;;  %v475_v51 = vsub.f32 %v219_v43, %v347_v46  ;;  %v221_v53 = vld [vmem:[%s1361_s19 + $0x70] sm:$0xff] }
  0x5e   : > { %v476_v52 = vsub.f32 %v220_v47, %v348_v48  ;;  %v349_v54 = vld [vmem:[%s1369_s29 + $0x70] sm:$0xff]  ;;  %727 = vst [vmem:[%s1390_s20 + $0x40] sm:$0xff] %v599_v44  ;;  %v222_v57 = vld [vmem:[%s1361_s19 + $0x78] sm:$0xff]  ;;  %v223_v59 = vld [vmem:[%s1361_s19 + $0x80] sm:$0xff]  ;;  %s1104_s27 = sshll.u32 %s1176_s26, 4  ;;  %s1105_s27 = int_to_ptr.vmem [resolvable:$false] %s1104_s27 }
  0x5f   : > { %v602_v55 = vand.u32 2147483647, %v474_v45  ;;  %v477_v56 = vsub.f32 %v221_v53, %v349_v54  ;;  %v350_v58 = vld [vmem:[%s1369_s29 + $0x78] sm:$0xff]  ;;  %728 = vst [vmem:[%s1390_s20 + $0x48] sm:$0xff] %v600_v49  ;;  %729 = vst [vmem:[%s1390_s20 + $0x50] sm:$0xff] %v601_v50  ;;  %v351_v63 = vld [vmem:[%s1369_s29 + $0x80] sm:$0xff]  ;;  %p1107_p5 = scmp.lt.s32.totalorder %s1765_s6, %s1105_s27 }
  0x60   : > { %v603_v60 = vand.u32 2147483647, %v475_v51  ;;  %v604_v61 = vand.u32 2147483647, %v476_v52  ;;  %v478_v62 = vsub.f32 %v222_v57, %v350_v58  ;;  %v224_v0 = vld [vmem:[%s1361_s19 + $0x88] sm:$0xff]  ;;  %v479_v2 = vsub.f32 %v223_v59, %v351_v63  ;;  %v225_v4 = vld [vmem:[%s1361_s19 + $0x90] sm:$0xff] }
  0x61   : > { %730 = vst [vmem:[%s1390_s20 + $0x58] sm:$0xff] %v602_v55  ;;  %v605_v1 = vand.u32 2147483647, %v477_v56  ;;  %v352_v3 = vld [vmem:[%s1369_s29 + $0x88] sm:$0xff]  ;;  %v353_v5 = vld [vmem:[%s1369_s29 + $0x90] sm:$0xff]  ;;  %v226_v9 = vld [vmem:[%s1361_s19 + $0x98] sm:$0xff] }
  0x62   : > { %731 = vst [vmem:[%s1390_s20 + $0x60] sm:$0xff] %v603_v60  ;;  %732 = vst [vmem:[%s1390_s20 + $0x68] sm:$0xff] %v604_v61  ;;  %v606_v6 = vand.u32 2147483647, %v478_v62  ;;  %v480_v7 = vsub.f32 %v224_v0, %v352_v3  ;;  %v481_v8 = vsub.f32 %v225_v4, %v353_v5  ;;  %v354_v10 = vld [vmem:[%s1369_s29 + $0x98] sm:$0xff]  ;;  %v227_v11 = vld [vmem:[%s1361_s19 + $0xa0] sm:$0xff] }
  0x63   : > { %733 = vst [vmem:[%s1390_s20 + $0x70] sm:$0xff] %v605_v1  ;;  %v607_v12 = vand.u32 2147483647, %v479_v2  ;;  %v482_v13 = vsub.f32 %v226_v9, %v354_v10  ;;  %v355_v14 = vld [vmem:[%s1369_s29 + $0xa0] sm:$0xff]  ;;  %v228_v15 = vld [vmem:[%s1361_s19 + $0xa8] sm:$0xff]  ;;  %v229_v21 = vld [vmem:[%s1361_s19 + $0xb0] sm:$0xff] }
  0x64   : > { %v356_v16 = vld [vmem:[%s1369_s29 + $0xa8] sm:$0xff]  ;;  %734 = vst [vmem:[%s1390_s20 + $0x78] sm:$0xff] %v606_v6  ;;  %v608_v17 = vand.u32 2147483647, %v480_v7  ;;  %v609_v18 = vand.u32 2147483647, %v481_v8  ;;  %v483_v19 = vsub.f32 %v227_v11, %v355_v14 }
  0x65   : > { %v484_v20 = vsub.f32 %v228_v15, %v356_v16  ;;  %v357_v22 = vld [vmem:[%s1369_s29 + $0xb0] sm:$0xff]  ;;  %735 = vst [vmem:[%s1390_s20 + $0x80] sm:$0xff] %v607_v12  ;;  %v610_v23 = vand.u32 2147483647, %v482_v13  ;;  %v230_v25 = vld [vmem:[%s1361_s19 + $0xb8] sm:$0xff]  ;;  %v231_v27 = vld [vmem:[%s1361_s19 + $0xc0] sm:$0xff] }
  0x66   : > { %v485_v24 = vsub.f32 %v229_v21, %v357_v22  ;;  %v358_v26 = vld [vmem:[%s1369_s29 + $0xb8] sm:$0xff]  ;;  %736 = vst [vmem:[%s1390_s20 + $0x88] sm:$0xff] %v608_v17  ;;  %737 = vst [vmem:[%s1390_s20 + $0x90] sm:$0xff] %v609_v18  ;;  %v611_v28 = vand.u32 2147483647, %v483_v19  ;;  %v359_v31 = vld [vmem:[%s1369_s29 + $0xc0] sm:$0xff] }
  0x67   : > { %v612_v29 = vand.u32 2147483647, %v484_v20  ;;  %v486_v30 = vsub.f32 %v230_v25, %v358_v26  ;;  %v232_v32 = vld [vmem:[%s1361_s19 + $0xc8] sm:$0xff]  ;;  %738 = vst [vmem:[%s1390_s20 + $0x98] sm:$0xff] %v610_v23  ;;  %v487_v34 = vsub.f32 %v231_v27, %v359_v31  ;;  %v233_v36 = vld [vmem:[%s1361_s19 + $0xd0] sm:$0xff]  ;;  %v234_v41 = vld [vmem:[%s1361_s19 + $0xd8] sm:$0xff] }
  0x68   : > { %v613_v33 = vand.u32 2147483647, %v485_v24  ;;  %v360_v35 = vld [vmem:[%s1369_s29 + $0xc8] sm:$0xff]  ;;  %v361_v37 = vld [vmem:[%s1369_s29 + $0xd0] sm:$0xff]  ;;  %739 = vst [vmem:[%s1390_s20 + $0xa0] sm:$0xff] %v611_v28  ;;  %v362_v42 = vld [vmem:[%s1369_s29 + $0xd8] sm:$0xff] }
  0x69   : > { %740 = vst [vmem:[%s1390_s20 + $0xa8] sm:$0xff] %v612_v29  ;;  %v614_v38 = vand.u32 2147483647, %v486_v30  ;;  %v488_v39 = vsub.f32 %v232_v32, %v360_v35  ;;  %v489_v40 = vsub.f32 %v233_v36, %v361_v37  ;;  %v235_v43 = vld [vmem:[%s1361_s19 + $0xe0] sm:$0xff]  ;;  %v615_v44 = vand.u32 2147483647, %v487_v34 }
  0x6a   : > { %741 = vst [vmem:[%s1390_s20 + $0xb0] sm:$0xff] %v613_v33  ;;  %v490_v45 = vsub.f32 %v234_v41, %v362_v42  ;;  %v363_v46 = vld [vmem:[%s1369_s29 + $0xe0] sm:$0xff]  ;;  %v236_v47 = vld [vmem:[%s1361_s19 + $0xe8] sm:$0xff]  ;;  %v237_v53 = vld [vmem:[%s1361_s19 + $0xf0] sm:$0xff]  ;;  %s1106_s25 = scalar_lea.vmem %s1105_s27, 32768 }
  0x6b   : > { %v364_v48 = vld [vmem:[%s1369_s29 + $0xe8] sm:$0xff]  ;;  %742 = vst [vmem:[%s1390_s20 + $0xb8] sm:$0xff] %v614_v38  ;;  %v616_v49 = vand.u32 2147483647, %v488_v39  ;;  %v617_v50 = vand.u32 2147483647, %v489_v40  ;;  %v491_v51 = vsub.f32 %v235_v43, %v363_v46  ;;  %p1108_p7 = scmp.lt.s32.totalorder %s1106_s25, %s1100_s24 }
  0x6c   : > { %v492_v52 = vsub.f32 %v236_v47, %v364_v48  ;;  %v365_v54 = vld [vmem:[%s1369_s29 + $0xf0] sm:$0xff]  ;;  %743 = vst [vmem:[%s1390_s20 + $0xc0] sm:$0xff] %v615_v44  ;;  %v618_v55 = vand.u32 2147483647, %v490_v45  ;;  %v238_v57 = vld [vmem:[%s1361_s19 + $0xf8] sm:$0xff]  ;;  %v239_v59 = vld [vmem:[%s1361_s19 + $0x100] sm:$0xff] }
  0x6d   : > { %v493_v56 = vsub.f32 %v237_v53, %v365_v54  ;;  %v366_v58 = vld [vmem:[%s1369_s29 + $0xf8] sm:$0xff]  ;;  %744 = vst [vmem:[%s1390_s20 + $0xc8] sm:$0xff] %v616_v49  ;;  %745 = vst [vmem:[%s1390_s20 + $0xd0] sm:$0xff] %v617_v50  ;;  %v619_v60 = vand.u32 2147483647, %v491_v51  ;;  %v367_v63 = vld [vmem:[%s1369_s29 + $0x100] sm:$0xff]  ;;  %p1109_p9 = por %p1108_p7, %p1107_p5 }
  0x6e   : > { %v620_v61 = vand.u32 2147483647, %v492_v52  ;;  %v494_v62 = vsub.f32 %v238_v57, %v366_v58  ;;  %v240_v0 = vld [vmem:[%s1361_s19 + $0x108] sm:$0xff]  ;;  %746 = vst [vmem:[%s1390_s20 + $0xd8] sm:$0xff] %v618_v55  ;;  %v495_v2 = vsub.f32 %v239_v59, %v367_v63  ;;  %v241_v4 = vld [vmem:[%s1361_s19 + $0x110] sm:$0xff]  ;;  %v242_v9 = vld [vmem:[%s1361_s19 + $0x118] sm:$0xff] }
  0x6f   : > { %v621_v1 = vand.u32 2147483647, %v493_v56  ;;  %v368_v3 = vld [vmem:[%s1369_s29 + $0x108] sm:$0xff]  ;;  %v369_v5 = vld [vmem:[%s1369_s29 + $0x110] sm:$0xff]  ;;  %747 = vst [vmem:[%s1390_s20 + $0xe0] sm:$0xff] %v619_v60  ;;  %v370_v10 = vld [vmem:[%s1369_s29 + $0x118] sm:$0xff]  ;;  %p1110_p11 = pnand %p1109_p9, %p1103_p10 }
  0x70   : > { %748 = vst [vmem:[%s1390_s20 + $0xe8] sm:$0xff] %v620_v61  ;;  %v622_v6 = vand.u32 2147483647, %v494_v62  ;;  %v496_v7 = vsub.f32 %v240_v0, %v368_v3  ;;  %v497_v8 = vsub.f32 %v241_v4, %v369_v5  ;;  %v243_v11 = vld [vmem:[%s1361_s19 + $0x120] sm:$0xff]  ;;  %v623_v12 = vand.u32 2147483647, %v495_v2 }
  0x71   : > { %749 = vst [vmem:[%s1390_s20 + $0xf0] sm:$0xff] %v621_v1  ;;  %v498_v13 = vsub.f32 %v242_v9, %v370_v10  ;;  %v371_v14 = vld [vmem:[%s1369_s29 + $0x120] sm:$0xff]  ;;  %v244_v15 = vld [vmem:[%s1361_s19 + $0x128] sm:$0xff]  ;;  %v245_v21 = vld [vmem:[%s1361_s19 + $0x130] sm:$0xff] }
  0x72   : > { %v372_v16 = vld [vmem:[%s1369_s29 + $0x128] sm:$0xff]  ;;  %750 = vst [vmem:[%s1390_s20 + $0xf8] sm:$0xff] %v622_v6  ;;  %v624_v17 = vand.u32 2147483647, %v496_v7  ;;  %v625_v18 = vand.u32 2147483647, %v497_v8  ;;  %v499_v19 = vsub.f32 %v243_v11, %v371_v14 }
  0x73   : > { %v500_v20 = vsub.f32 %v244_v15, %v372_v16  ;;  %v373_v22 = vld [vmem:[%s1369_s29 + $0x130] sm:$0xff]  ;;  %751 = vst [vmem:[%s1390_s20 + $0x100] sm:$0xff] %v623_v12  ;;  %v626_v23 = vand.u32 2147483647, %v498_v13  ;;  %v246_v25 = vld [vmem:[%s1361_s19 + $0x138] sm:$0xff]  ;;  %v247_v27 = vld [vmem:[%s1361_s19 + $0x140] sm:$0xff] }
  0x74   : > { %v501_v24 = vsub.f32 %v245_v21, %v373_v22  ;;  %v374_v26 = vld [vmem:[%s1369_s29 + $0x138] sm:$0xff]  ;;  %752 = vst [vmem:[%s1390_s20 + $0x108] sm:$0xff] %v624_v17  ;;  %753 = vst [vmem:[%s1390_s20 + $0x110] sm:$0xff] %v625_v18  ;;  %v627_v28 = vand.u32 2147483647, %v499_v19  ;;  %v375_v31 = vld [vmem:[%s1369_s29 + $0x140] sm:$0xff] }
  0x75   : > { %v628_v29 = vand.u32 2147483647, %v500_v20  ;;  %v502_v30 = vsub.f32 %v246_v25, %v374_v26  ;;  %v248_v32 = vld [vmem:[%s1361_s19 + $0x148] sm:$0xff]  ;;  %754 = vst [vmem:[%s1390_s20 + $0x118] sm:$0xff] %v626_v23  ;;  %v503_v34 = vsub.f32 %v247_v27, %v375_v31  ;;  %v249_v36 = vld [vmem:[%s1361_s19 + $0x150] sm:$0xff]  ;;  %v250_v41 = vld [vmem:[%s1361_s19 + $0x158] sm:$0xff] }
  0x76   : > { %v629_v33 = vand.u32 2147483647, %v501_v24  ;;  %v376_v35 = vld [vmem:[%s1369_s29 + $0x148] sm:$0xff]  ;;  %v377_v37 = vld [vmem:[%s1369_s29 + $0x150] sm:$0xff]  ;;  %755 = vst [vmem:[%s1390_s20 + $0x120] sm:$0xff] %v627_v28  ;;  %v378_v42 = vld [vmem:[%s1369_s29 + $0x158] sm:$0xff] }
  0x77   : > { %756 = vst [vmem:[%s1390_s20 + $0x128] sm:$0xff] %v628_v29  ;;  %v630_v38 = vand.u32 2147483647, %v502_v30  ;;  %v504_v39 = vsub.f32 %v248_v32, %v376_v35  ;;  %v505_v40 = vsub.f32 %v249_v36, %v377_v37  ;;  %v251_v43 = vld [vmem:[%s1361_s19 + $0x160] sm:$0xff]  ;;  %v631_v44 = vand.u32 2147483647, %v503_v34 }
  0x78   : > { %757 = vst [vmem:[%s1390_s20 + $0x130] sm:$0xff] %v629_v33  ;;  %v506_v45 = vsub.f32 %v250_v41, %v378_v42  ;;  %v379_v46 = vld [vmem:[%s1369_s29 + $0x160] sm:$0xff]  ;;  %v252_v47 = vld [vmem:[%s1361_s19 + $0x168] sm:$0xff]  ;;  %v253_v53 = vld [vmem:[%s1361_s19 + $0x170] sm:$0xff] }
  0x79   : > { %v380_v48 = vld [vmem:[%s1369_s29 + $0x168] sm:$0xff]  ;;  %758 = vst [vmem:[%s1390_s20 + $0x138] sm:$0xff] %v630_v38  ;;  %v632_v49 = vand.u32 2147483647, %v504_v39  ;;  %v633_v50 = vand.u32 2147483647, %v505_v40  ;;  %v507_v51 = vsub.f32 %v251_v43, %v379_v46 }
  0x7a   : > { %v508_v52 = vsub.f32 %v252_v47, %v380_v48  ;;  %v381_v54 = vld [vmem:[%s1369_s29 + $0x170] sm:$0xff]  ;;  %759 = vst [vmem:[%s1390_s20 + $0x140] sm:$0xff] %v631_v44  ;;  %v634_v55 = vand.u32 2147483647, %v506_v45  ;;  %v254_v57 = vld [vmem:[%s1361_s19 + $0x178] sm:$0xff]  ;;  %v255_v59 = vld [vmem:[%s1361_s19 + $0x180] sm:$0xff] }
  0x7b   : > { %v509_v56 = vsub.f32 %v253_v53, %v381_v54  ;;  %v382_v58 = vld [vmem:[%s1369_s29 + $0x178] sm:$0xff]  ;;  %760 = vst [vmem:[%s1390_s20 + $0x148] sm:$0xff] %v632_v49  ;;  %761 = vst [vmem:[%s1390_s20 + $0x150] sm:$0xff] %v633_v50  ;;  %v635_v60 = vand.u32 2147483647, %v507_v51  ;;  %v383_v63 = vld [vmem:[%s1369_s29 + $0x180] sm:$0xff] }
  0x7c   : > { %v636_v61 = vand.u32 2147483647, %v508_v52  ;;  %v510_v62 = vsub.f32 %v254_v57, %v382_v58  ;;  %v256_v0 = vld [vmem:[%s1361_s19 + $0x188] sm:$0xff]  ;;  %762 = vst [vmem:[%s1390_s20 + $0x158] sm:$0xff] %v634_v55  ;;  %v511_v2 = vsub.f32 %v255_v59, %v383_v63  ;;  %v257_v4 = vld [vmem:[%s1361_s19 + $0x190] sm:$0xff]  ;;  %v258_v9 = vld [vmem:[%s1361_s19 + $0x198] sm:$0xff] }
  0x7d   : > { %v637_v1 = vand.u32 2147483647, %v509_v56  ;;  %v384_v3 = vld [vmem:[%s1369_s29 + $0x188] sm:$0xff]  ;;  %v385_v5 = vld [vmem:[%s1369_s29 + $0x190] sm:$0xff]  ;;  %763 = vst [vmem:[%s1390_s20 + $0x160] sm:$0xff] %v635_v60  ;;  %v386_v10 = vld [vmem:[%s1369_s29 + $0x198] sm:$0xff] }
  0x7e   : > { %764 = vst [vmem:[%s1390_s20 + $0x168] sm:$0xff] %v636_v61  ;;  %v638_v6 = vand.u32 2147483647, %v510_v62  ;;  %v512_v7 = vsub.f32 %v256_v0, %v384_v3  ;;  %v513_v8 = vsub.f32 %v257_v4, %v385_v5  ;;  %v259_v11 = vld [vmem:[%s1361_s19 + $0x1a0] sm:$0xff]  ;;  %v639_v12 = vand.u32 2147483647, %v511_v2 }
  0x7f   : > { %765 = vst [vmem:[%s1390_s20 + $0x170] sm:$0xff] %v637_v1  ;;  %v514_v13 = vsub.f32 %v258_v9, %v386_v10  ;;  %v387_v14 = vld [vmem:[%s1369_s29 + $0x1a0] sm:$0xff]  ;;  %v260_v15 = vld [vmem:[%s1361_s19 + $0x1a8] sm:$0xff]  ;;  %v261_v21 = vld [vmem:[%s1361_s19 + $0x1b0] sm:$0xff] }
  0x80   : > { %v388_v16 = vld [vmem:[%s1369_s29 + $0x1a8] sm:$0xff]  ;;  %766 = vst [vmem:[%s1390_s20 + $0x178] sm:$0xff] %v638_v6  ;;  %v640_v17 = vand.u32 2147483647, %v512_v7  ;;  %v641_v18 = vand.u32 2147483647, %v513_v8  ;;  %v515_v19 = vsub.f32 %v259_v11, %v387_v14 }
  0x81   : > { %v516_v20 = vsub.f32 %v260_v15, %v388_v16  ;;  %v389_v22 = vld [vmem:[%s1369_s29 + $0x1b0] sm:$0xff]  ;;  %767 = vst [vmem:[%s1390_s20 + $0x180] sm:$0xff] %v639_v12  ;;  %v642_v23 = vand.u32 2147483647, %v514_v13  ;;  %v262_v25 = vld [vmem:[%s1361_s19 + $0x1b8] sm:$0xff]  ;;  %v263_v27 = vld [vmem:[%s1361_s19 + $0x1c0] sm:$0xff] }
  0x82   : > { %v517_v24 = vsub.f32 %v261_v21, %v389_v22  ;;  %v390_v26 = vld [vmem:[%s1369_s29 + $0x1b8] sm:$0xff]  ;;  %768 = vst [vmem:[%s1390_s20 + $0x188] sm:$0xff] %v640_v17  ;;  %769 = vst [vmem:[%s1390_s20 + $0x190] sm:$0xff] %v641_v18  ;;  %v643_v28 = vand.u32 2147483647, %v515_v19  ;;  %v391_v31 = vld [vmem:[%s1369_s29 + $0x1c0] sm:$0xff] }
  0x83   : > { %v644_v29 = vand.u32 2147483647, %v516_v20  ;;  %v518_v30 = vsub.f32 %v262_v25, %v390_v26  ;;  %v264_v32 = vld [vmem:[%s1361_s19 + $0x1c8] sm:$0xff]  ;;  %770 = vst [vmem:[%s1390_s20 + $0x198] sm:$0xff] %v642_v23  ;;  %v519_v34 = vsub.f32 %v263_v27, %v391_v31  ;;  %v265_v36 = vld [vmem:[%s1361_s19 + $0x1d0] sm:$0xff]  ;;  %v266_v41 = vld [vmem:[%s1361_s19 + $0x1d8] sm:$0xff] }
  0x84   : > { %v645_v33 = vand.u32 2147483647, %v517_v24  ;;  %v392_v35 = vld [vmem:[%s1369_s29 + $0x1c8] sm:$0xff]  ;;  %v393_v37 = vld [vmem:[%s1369_s29 + $0x1d0] sm:$0xff]  ;;  %771 = vst [vmem:[%s1390_s20 + $0x1a0] sm:$0xff] %v643_v28  ;;  %v394_v42 = vld [vmem:[%s1369_s29 + $0x1d8] sm:$0xff] }
  0x85   : > { %772 = vst [vmem:[%s1390_s20 + $0x1a8] sm:$0xff] %v644_v29  ;;  %v646_v38 = vand.u32 2147483647, %v518_v30  ;;  %v520_v39 = vsub.f32 %v264_v32, %v392_v35  ;;  %v521_v40 = vsub.f32 %v265_v36, %v393_v37  ;;  %v267_v43 = vld [vmem:[%s1361_s19 + $0x1e0] sm:$0xff]  ;;  %v647_v44 = vand.u32 2147483647, %v519_v34 }
  0x86   : > { %773 = vst [vmem:[%s1390_s20 + $0x1b0] sm:$0xff] %v645_v33  ;;  %v522_v45 = vsub.f32 %v266_v41, %v394_v42  ;;  %v395_v46 = vld [vmem:[%s1369_s29 + $0x1e0] sm:$0xff]  ;;  %v268_v47 = vld [vmem:[%s1361_s19 + $0x1e8] sm:$0xff]  ;;  %v269_v53 = vld [vmem:[%s1361_s19 + $0x1f0] sm:$0xff] }
  0x87   : > { %v396_v48 = vld [vmem:[%s1369_s29 + $0x1e8] sm:$0xff]  ;;  %774 = vst [vmem:[%s1390_s20 + $0x1b8] sm:$0xff] %v646_v38  ;;  %v648_v49 = vand.u32 2147483647, %v520_v39  ;;  %v649_v50 = vand.u32 2147483647, %v521_v40  ;;  %v523_v51 = vsub.f32 %v267_v43, %v395_v46 }
  0x88   : > { %v524_v52 = vsub.f32 %v268_v47, %v396_v48  ;;  %v397_v54 = vld [vmem:[%s1369_s29 + $0x1f0] sm:$0xff]  ;;  %775 = vst [vmem:[%s1390_s20 + $0x1c0] sm:$0xff] %v647_v44  ;;  %v650_v55 = vand.u32 2147483647, %v522_v45  ;;  %v270_v57 = vld [vmem:[%s1361_s19 + $0x1f8] sm:$0xff]  ;;  %v271_v59 = vld [vmem:[%s1361_s19 + $0x200] sm:$0xff] }
  0x89   : > { %v525_v56 = vsub.f32 %v269_v53, %v397_v54  ;;  %v398_v58 = vld [vmem:[%s1369_s29 + $0x1f8] sm:$0xff]  ;;  %776 = vst [vmem:[%s1390_s20 + $0x1c8] sm:$0xff] %v648_v49  ;;  %777 = vst [vmem:[%s1390_s20 + $0x1d0] sm:$0xff] %v649_v50  ;;  %v651_v60 = vand.u32 2147483647, %v523_v51  ;;  %v399_v63 = vld [vmem:[%s1369_s29 + $0x200] sm:$0xff] }
  0x8a   : > { %v652_v61 = vand.u32 2147483647, %v524_v52  ;;  %v526_v62 = vsub.f32 %v270_v57, %v398_v58  ;;  %v272_v0 = vld [vmem:[%s1361_s19 + $0x208] sm:$0xff]  ;;  %778 = vst [vmem:[%s1390_s20 + $0x1d8] sm:$0xff] %v650_v55  ;;  %v527_v2 = vsub.f32 %v271_v59, %v399_v63  ;;  %v273_v4 = vld [vmem:[%s1361_s19 + $0x210] sm:$0xff]  ;;  %v274_v9 = vld [vmem:[%s1361_s19 + $0x218] sm:$0xff] }
  0x8b   : > { %v653_v1 = vand.u32 2147483647, %v525_v56  ;;  %v400_v3 = vld [vmem:[%s1369_s29 + $0x208] sm:$0xff]  ;;  %v401_v5 = vld [vmem:[%s1369_s29 + $0x210] sm:$0xff]  ;;  %779 = vst [vmem:[%s1390_s20 + $0x1e0] sm:$0xff] %v651_v60  ;;  %v402_v10 = vld [vmem:[%s1369_s29 + $0x218] sm:$0xff] }
  0x8c   : > { %780 = vst [vmem:[%s1390_s20 + $0x1e8] sm:$0xff] %v652_v61  ;;  %v654_v6 = vand.u32 2147483647, %v526_v62  ;;  %v528_v7 = vsub.f32 %v272_v0, %v400_v3  ;;  %v529_v8 = vsub.f32 %v273_v4, %v401_v5  ;;  %v275_v11 = vld [vmem:[%s1361_s19 + $0x220] sm:$0xff]  ;;  %v655_v12 = vand.u32 2147483647, %v527_v2 }
  0x8d   : > { %781 = vst [vmem:[%s1390_s20 + $0x1f0] sm:$0xff] %v653_v1  ;;  %v530_v13 = vsub.f32 %v274_v9, %v402_v10  ;;  %v403_v14 = vld [vmem:[%s1369_s29 + $0x220] sm:$0xff]  ;;  %v276_v15 = vld [vmem:[%s1361_s19 + $0x228] sm:$0xff]  ;;  %v277_v21 = vld [vmem:[%s1361_s19 + $0x230] sm:$0xff] }
  0x8e   : > { %v404_v16 = vld [vmem:[%s1369_s29 + $0x228] sm:$0xff]  ;;  %782 = vst [vmem:[%s1390_s20 + $0x1f8] sm:$0xff] %v654_v6  ;;  %v656_v17 = vand.u32 2147483647, %v528_v7  ;;  %v657_v18 = vand.u32 2147483647, %v529_v8  ;;  %v531_v19 = vsub.f32 %v275_v11, %v403_v14 }
  0x8f   : > { %v532_v20 = vsub.f32 %v276_v15, %v404_v16  ;;  %v405_v22 = vld [vmem:[%s1369_s29 + $0x230] sm:$0xff]  ;;  %783 = vst [vmem:[%s1390_s20 + $0x200] sm:$0xff] %v655_v12  ;;  %v658_v23 = vand.u32 2147483647, %v530_v13  ;;  %v278_v25 = vld [vmem:[%s1361_s19 + $0x238] sm:$0xff]  ;;  %v279_v27 = vld [vmem:[%s1361_s19 + $0x240] sm:$0xff] }
  0x90   : > { %v533_v24 = vsub.f32 %v277_v21, %v405_v22  ;;  %v406_v26 = vld [vmem:[%s1369_s29 + $0x238] sm:$0xff]  ;;  %784 = vst [vmem:[%s1390_s20 + $0x208] sm:$0xff] %v656_v17  ;;  %785 = vst [vmem:[%s1390_s20 + $0x210] sm:$0xff] %v657_v18  ;;  %v659_v28 = vand.u32 2147483647, %v531_v19  ;;  %v407_v31 = vld [vmem:[%s1369_s29 + $0x240] sm:$0xff] }
  0x91   : > { %v660_v29 = vand.u32 2147483647, %v532_v20  ;;  %v534_v30 = vsub.f32 %v278_v25, %v406_v26  ;;  %v280_v32 = vld [vmem:[%s1361_s19 + $0x248] sm:$0xff]  ;;  %786 = vst [vmem:[%s1390_s20 + $0x218] sm:$0xff] %v658_v23  ;;  %v535_v34 = vsub.f32 %v279_v27, %v407_v31  ;;  %v281_v36 = vld [vmem:[%s1361_s19 + $0x250] sm:$0xff]  ;;  %v282_v41 = vld [vmem:[%s1361_s19 + $0x258] sm:$0xff] }
  0x92   : > { %v661_v33 = vand.u32 2147483647, %v533_v24  ;;  %v408_v35 = vld [vmem:[%s1369_s29 + $0x248] sm:$0xff]  ;;  %v409_v37 = vld [vmem:[%s1369_s29 + $0x250] sm:$0xff]  ;;  %787 = vst [vmem:[%s1390_s20 + $0x220] sm:$0xff] %v659_v28  ;;  %v410_v42 = vld [vmem:[%s1369_s29 + $0x258] sm:$0xff] }
  0x93   : > { %788 = vst [vmem:[%s1390_s20 + $0x228] sm:$0xff] %v660_v29  ;;  %v662_v38 = vand.u32 2147483647, %v534_v30  ;;  %v536_v39 = vsub.f32 %v280_v32, %v408_v35  ;;  %v537_v40 = vsub.f32 %v281_v36, %v409_v37  ;;  %v283_v43 = vld [vmem:[%s1361_s19 + $0x260] sm:$0xff]  ;;  %v663_v44 = vand.u32 2147483647, %v535_v34 }
  0x94   : > { %789 = vst [vmem:[%s1390_s20 + $0x230] sm:$0xff] %v661_v33  ;;  %v538_v45 = vsub.f32 %v282_v41, %v410_v42  ;;  %v411_v46 = vld [vmem:[%s1369_s29 + $0x260] sm:$0xff]  ;;  %v284_v47 = vld [vmem:[%s1361_s19 + $0x268] sm:$0xff]  ;;  %v285_v53 = vld [vmem:[%s1361_s19 + $0x270] sm:$0xff] }
  0x95   : > { %v412_v48 = vld [vmem:[%s1369_s29 + $0x268] sm:$0xff]  ;;  %790 = vst [vmem:[%s1390_s20 + $0x238] sm:$0xff] %v662_v38  ;;  %v664_v49 = vand.u32 2147483647, %v536_v39  ;;  %v665_v50 = vand.u32 2147483647, %v537_v40  ;;  %v539_v51 = vsub.f32 %v283_v43, %v411_v46 }
  0x96   : > { %v540_v52 = vsub.f32 %v284_v47, %v412_v48  ;;  %v413_v54 = vld [vmem:[%s1369_s29 + $0x270] sm:$0xff]  ;;  %791 = vst [vmem:[%s1390_s20 + $0x240] sm:$0xff] %v663_v44  ;;  %v666_v55 = vand.u32 2147483647, %v538_v45  ;;  %v286_v57 = vld [vmem:[%s1361_s19 + $0x278] sm:$0xff]  ;;  %v287_v59 = vld [vmem:[%s1361_s19 + $0x280] sm:$0xff] }
  0x97   : > { %v541_v56 = vsub.f32 %v285_v53, %v413_v54  ;;  %v414_v58 = vld [vmem:[%s1369_s29 + $0x278] sm:$0xff]  ;;  %792 = vst [vmem:[%s1390_s20 + $0x248] sm:$0xff] %v664_v49  ;;  %793 = vst [vmem:[%s1390_s20 + $0x250] sm:$0xff] %v665_v50  ;;  %v667_v60 = vand.u32 2147483647, %v539_v51  ;;  %v415_v63 = vld [vmem:[%s1369_s29 + $0x280] sm:$0xff] }
  0x98   : > { %v668_v61 = vand.u32 2147483647, %v540_v52  ;;  %v542_v62 = vsub.f32 %v286_v57, %v414_v58  ;;  %v288_v0 = vld [vmem:[%s1361_s19 + $0x288] sm:$0xff]  ;;  %794 = vst [vmem:[%s1390_s20 + $0x258] sm:$0xff] %v666_v55  ;;  %v543_v2 = vsub.f32 %v287_v59, %v415_v63  ;;  %v289_v4 = vld [vmem:[%s1361_s19 + $0x290] sm:$0xff]  ;;  %v290_v9 = vld [vmem:[%s1361_s19 + $0x298] sm:$0xff] }
  0x99   : > { %v669_v1 = vand.u32 2147483647, %v541_v56  ;;  %v416_v3 = vld [vmem:[%s1369_s29 + $0x288] sm:$0xff]  ;;  %v417_v5 = vld [vmem:[%s1369_s29 + $0x290] sm:$0xff]  ;;  %795 = vst [vmem:[%s1390_s20 + $0x260] sm:$0xff] %v667_v60  ;;  %v418_v10 = vld [vmem:[%s1369_s29 + $0x298] sm:$0xff] }
  0x9a   : > { %796 = vst [vmem:[%s1390_s20 + $0x268] sm:$0xff] %v668_v61  ;;  %v670_v6 = vand.u32 2147483647, %v542_v62  ;;  %v544_v7 = vsub.f32 %v288_v0, %v416_v3  ;;  %v545_v8 = vsub.f32 %v289_v4, %v417_v5  ;;  %v291_v11 = vld [vmem:[%s1361_s19 + $0x2a0] sm:$0xff]  ;;  %v671_v12 = vand.u32 2147483647, %v543_v2 }
  0x9b   : > { %797 = vst [vmem:[%s1390_s20 + $0x270] sm:$0xff] %v669_v1  ;;  %v546_v13 = vsub.f32 %v290_v9, %v418_v10  ;;  %v419_v14 = vld [vmem:[%s1369_s29 + $0x2a0] sm:$0xff]  ;;  %v292_v15 = vld [vmem:[%s1361_s19 + $0x2a8] sm:$0xff]  ;;  %v293_v21 = vld [vmem:[%s1361_s19 + $0x2b0] sm:$0xff] }
  0x9c   : > { %v420_v16 = vld [vmem:[%s1369_s29 + $0x2a8] sm:$0xff]  ;;  %798 = vst [vmem:[%s1390_s20 + $0x278] sm:$0xff] %v670_v6  ;;  %v672_v17 = vand.u32 2147483647, %v544_v7  ;;  %v673_v18 = vand.u32 2147483647, %v545_v8  ;;  %v547_v19 = vsub.f32 %v291_v11, %v419_v14 }
  0x9d   : > { %v548_v20 = vsub.f32 %v292_v15, %v420_v16  ;;  %v421_v22 = vld [vmem:[%s1369_s29 + $0x2b0] sm:$0xff]  ;;  %799 = vst [vmem:[%s1390_s20 + $0x280] sm:$0xff] %v671_v12  ;;  %v674_v23 = vand.u32 2147483647, %v546_v13  ;;  %v294_v25 = vld [vmem:[%s1361_s19 + $0x2b8] sm:$0xff]  ;;  %v295_v27 = vld [vmem:[%s1361_s19 + $0x2c0] sm:$0xff] }
  0x9e   : > { %v549_v24 = vsub.f32 %v293_v21, %v421_v22  ;;  %v422_v26 = vld [vmem:[%s1369_s29 + $0x2b8] sm:$0xff]  ;;  %800 = vst [vmem:[%s1390_s20 + $0x288] sm:$0xff] %v672_v17  ;;  %801 = vst [vmem:[%s1390_s20 + $0x290] sm:$0xff] %v673_v18  ;;  %v675_v28 = vand.u32 2147483647, %v547_v19  ;;  %v423_v31 = vld [vmem:[%s1369_s29 + $0x2c0] sm:$0xff] }
  0x9f   : > { %v676_v29 = vand.u32 2147483647, %v548_v20  ;;  %v550_v30 = vsub.f32 %v294_v25, %v422_v26  ;;  %v296_v32 = vld [vmem:[%s1361_s19 + $0x2c8] sm:$0xff]  ;;  %802 = vst [vmem:[%s1390_s20 + $0x298] sm:$0xff] %v674_v23  ;;  %v551_v34 = vsub.f32 %v295_v27, %v423_v31  ;;  %v297_v36 = vld [vmem:[%s1361_s19 + $0x2d0] sm:$0xff]  ;;  %v298_v41 = vld [vmem:[%s1361_s19 + $0x2d8] sm:$0xff] }
  0xa0   : > { %v677_v33 = vand.u32 2147483647, %v549_v24  ;;  %v424_v35 = vld [vmem:[%s1369_s29 + $0x2c8] sm:$0xff]  ;;  %v425_v37 = vld [vmem:[%s1369_s29 + $0x2d0] sm:$0xff]  ;;  %803 = vst [vmem:[%s1390_s20 + $0x2a0] sm:$0xff] %v675_v28  ;;  %v426_v42 = vld [vmem:[%s1369_s29 + $0x2d8] sm:$0xff] }
  0xa1   : > { %804 = vst [vmem:[%s1390_s20 + $0x2a8] sm:$0xff] %v676_v29  ;;  %v678_v38 = vand.u32 2147483647, %v550_v30  ;;  %v552_v39 = vsub.f32 %v296_v32, %v424_v35  ;;  %v553_v40 = vsub.f32 %v297_v36, %v425_v37  ;;  %v299_v43 = vld [vmem:[%s1361_s19 + $0x2e0] sm:$0xff]  ;;  %v679_v44 = vand.u32 2147483647, %v551_v34 }
  0xa2   : > { %805 = vst [vmem:[%s1390_s20 + $0x2b0] sm:$0xff] %v677_v33  ;;  %v554_v45 = vsub.f32 %v298_v41, %v426_v42  ;;  %v427_v46 = vld [vmem:[%s1369_s29 + $0x2e0] sm:$0xff]  ;;  %v300_v47 = vld [vmem:[%s1361_s19 + $0x2e8] sm:$0xff]  ;;  %v301_v53 = vld [vmem:[%s1361_s19 + $0x2f0] sm:$0xff] }
  0xa3   : > { %v428_v48 = vld [vmem:[%s1369_s29 + $0x2e8] sm:$0xff]  ;;  %806 = vst [vmem:[%s1390_s20 + $0x2b8] sm:$0xff] %v678_v38  ;;  %v680_v49 = vand.u32 2147483647, %v552_v39  ;;  %v681_v50 = vand.u32 2147483647, %v553_v40  ;;  %v555_v51 = vsub.f32 %v299_v43, %v427_v46 }
  0xa4   : > { %v556_v52 = vsub.f32 %v300_v47, %v428_v48  ;;  %v429_v54 = vld [vmem:[%s1369_s29 + $0x2f0] sm:$0xff]  ;;  %807 = vst [vmem:[%s1390_s20 + $0x2c0] sm:$0xff] %v679_v44  ;;  %v682_v55 = vand.u32 2147483647, %v554_v45  ;;  %v302_v57 = vld [vmem:[%s1361_s19 + $0x2f8] sm:$0xff]  ;;  %v303_v59 = vld [vmem:[%s1361_s19 + $0x300] sm:$0xff] }
  0xa5   : > { %v557_v56 = vsub.f32 %v301_v53, %v429_v54  ;;  %v430_v58 = vld [vmem:[%s1369_s29 + $0x2f8] sm:$0xff]  ;;  %808 = vst [vmem:[%s1390_s20 + $0x2c8] sm:$0xff] %v680_v49  ;;  %809 = vst [vmem:[%s1390_s20 + $0x2d0] sm:$0xff] %v681_v50  ;;  %v683_v60 = vand.u32 2147483647, %v555_v51  ;;  %v431_v63 = vld [vmem:[%s1369_s29 + $0x300] sm:$0xff] }
  0xa6   : > { %v684_v61 = vand.u32 2147483647, %v556_v52  ;;  %v558_v62 = vsub.f32 %v302_v57, %v430_v58  ;;  %v304_v0 = vld [vmem:[%s1361_s19 + $0x308] sm:$0xff]  ;;  %810 = vst [vmem:[%s1390_s20 + $0x2d8] sm:$0xff] %v682_v55  ;;  %v559_v2 = vsub.f32 %v303_v59, %v431_v63  ;;  %v305_v4 = vld [vmem:[%s1361_s19 + $0x310] sm:$0xff]  ;;  %v306_v9 = vld [vmem:[%s1361_s19 + $0x318] sm:$0xff] }
  0xa7   : > { %v685_v1 = vand.u32 2147483647, %v557_v56  ;;  %v432_v3 = vld [vmem:[%s1369_s29 + $0x308] sm:$0xff]  ;;  %v433_v5 = vld [vmem:[%s1369_s29 + $0x310] sm:$0xff]  ;;  %811 = vst [vmem:[%s1390_s20 + $0x2e0] sm:$0xff] %v683_v60  ;;  %v434_v10 = vld [vmem:[%s1369_s29 + $0x318] sm:$0xff] }
  0xa8   : > { %812 = vst [vmem:[%s1390_s20 + $0x2e8] sm:$0xff] %v684_v61  ;;  %v686_v6 = vand.u32 2147483647, %v558_v62  ;;  %v560_v7 = vsub.f32 %v304_v0, %v432_v3  ;;  %v561_v8 = vsub.f32 %v305_v4, %v433_v5  ;;  %v307_v11 = vld [vmem:[%s1361_s19 + $0x320] sm:$0xff]  ;;  %v687_v12 = vand.u32 2147483647, %v559_v2 }
  0xa9   : > { %813 = vst [vmem:[%s1390_s20 + $0x2f0] sm:$0xff] %v685_v1  ;;  %v562_v13 = vsub.f32 %v306_v9, %v434_v10  ;;  %v435_v14 = vld [vmem:[%s1369_s29 + $0x320] sm:$0xff]  ;;  %v308_v15 = vld [vmem:[%s1361_s19 + $0x328] sm:$0xff]  ;;  %v309_v21 = vld [vmem:[%s1361_s19 + $0x330] sm:$0xff] }
  0xaa   : > { %v436_v16 = vld [vmem:[%s1369_s29 + $0x328] sm:$0xff]  ;;  %814 = vst [vmem:[%s1390_s20 + $0x2f8] sm:$0xff] %v686_v6  ;;  %v688_v17 = vand.u32 2147483647, %v560_v7  ;;  %v689_v18 = vand.u32 2147483647, %v561_v8  ;;  %v563_v19 = vsub.f32 %v307_v11, %v435_v14 }
  0xab   : > { %v564_v20 = vsub.f32 %v308_v15, %v436_v16  ;;  %v437_v22 = vld [vmem:[%s1369_s29 + $0x330] sm:$0xff]  ;;  %815 = vst [vmem:[%s1390_s20 + $0x300] sm:$0xff] %v687_v12  ;;  %v690_v23 = vand.u32 2147483647, %v562_v13  ;;  %v310_v25 = vld [vmem:[%s1361_s19 + $0x338] sm:$0xff]  ;;  %v311_v27 = vld [vmem:[%s1361_s19 + $0x340] sm:$0xff] }
  0xac   : > { %v565_v24 = vsub.f32 %v309_v21, %v437_v22  ;;  %v438_v26 = vld [vmem:[%s1369_s29 + $0x338] sm:$0xff]  ;;  %816 = vst [vmem:[%s1390_s20 + $0x308] sm:$0xff] %v688_v17  ;;  %817 = vst [vmem:[%s1390_s20 + $0x310] sm:$0xff] %v689_v18  ;;  %v691_v28 = vand.u32 2147483647, %v563_v19  ;;  %v439_v31 = vld [vmem:[%s1369_s29 + $0x340] sm:$0xff] }
  0xad   : > { %v692_v29 = vand.u32 2147483647, %v564_v20  ;;  %v566_v30 = vsub.f32 %v310_v25, %v438_v26  ;;  %v312_v32 = vld [vmem:[%s1361_s19 + $0x348] sm:$0xff]  ;;  %818 = vst [vmem:[%s1390_s20 + $0x318] sm:$0xff] %v690_v23  ;;  %v567_v34 = vsub.f32 %v311_v27, %v439_v31  ;;  %v313_v36 = vld [vmem:[%s1361_s19 + $0x350] sm:$0xff]  ;;  %v314_v41 = vld [vmem:[%s1361_s19 + $0x358] sm:$0xff] }
  0xae   : > { %v693_v33 = vand.u32 2147483647, %v565_v24  ;;  %v440_v35 = vld [vmem:[%s1369_s29 + $0x348] sm:$0xff]  ;;  %v441_v37 = vld [vmem:[%s1369_s29 + $0x350] sm:$0xff]  ;;  %819 = vst [vmem:[%s1390_s20 + $0x320] sm:$0xff] %v691_v28  ;;  %v442_v42 = vld [vmem:[%s1369_s29 + $0x358] sm:$0xff] }
  0xaf   : > { %820 = vst [vmem:[%s1390_s20 + $0x328] sm:$0xff] %v692_v29  ;;  %v694_v38 = vand.u32 2147483647, %v566_v30  ;;  %v568_v39 = vsub.f32 %v312_v32, %v440_v35  ;;  %v569_v40 = vsub.f32 %v313_v36, %v441_v37  ;;  %v315_v43 = vld [vmem:[%s1361_s19 + $0x360] sm:$0xff]  ;;  %v695_v44 = vand.u32 2147483647, %v567_v34 }
  0xb0   : > { %821 = vst [vmem:[%s1390_s20 + $0x330] sm:$0xff] %v693_v33  ;;  %v570_v45 = vsub.f32 %v314_v41, %v442_v42  ;;  %v443_v46 = vld [vmem:[%s1369_s29 + $0x360] sm:$0xff]  ;;  %v316_v47 = vld [vmem:[%s1361_s19 + $0x368] sm:$0xff]  ;;  %v317_v53 = vld [vmem:[%s1361_s19 + $0x370] sm:$0xff] }
  0xb1   : > { %v444_v48 = vld [vmem:[%s1369_s29 + $0x368] sm:$0xff]  ;;  %822 = vst [vmem:[%s1390_s20 + $0x338] sm:$0xff] %v694_v38  ;;  %v696_v49 = vand.u32 2147483647, %v568_v39  ;;  %v697_v50 = vand.u32 2147483647, %v569_v40  ;;  %v571_v51 = vsub.f32 %v315_v43, %v443_v46 }
  0xb2   : > { %v572_v52 = vsub.f32 %v316_v47, %v444_v48  ;;  %v445_v54 = vld [vmem:[%s1369_s29 + $0x370] sm:$0xff]  ;;  %823 = vst [vmem:[%s1390_s20 + $0x340] sm:$0xff] %v695_v44  ;;  %v698_v55 = vand.u32 2147483647, %v570_v45  ;;  %v318_v57 = vld [vmem:[%s1361_s19 + $0x378] sm:$0xff]  ;;  %v319_v59 = vld [vmem:[%s1361_s19 + $0x380] sm:$0xff] }
  0xb3   : > { %v573_v56 = vsub.f32 %v317_v53, %v445_v54  ;;  %v446_v58 = vld [vmem:[%s1369_s29 + $0x378] sm:$0xff]  ;;  %824 = vst [vmem:[%s1390_s20 + $0x348] sm:$0xff] %v696_v49  ;;  %825 = vst [vmem:[%s1390_s20 + $0x350] sm:$0xff] %v697_v50  ;;  %v699_v60 = vand.u32 2147483647, %v571_v51  ;;  %v447_v63 = vld [vmem:[%s1369_s29 + $0x380] sm:$0xff] }
  0xb4   : > { %v700_v61 = vand.u32 2147483647, %v572_v52  ;;  %v574_v62 = vsub.f32 %v318_v57, %v446_v58  ;;  %v320_v0 = vld [vmem:[%s1361_s19 + $0x388] sm:$0xff]  ;;  %826 = vst [vmem:[%s1390_s20 + $0x358] sm:$0xff] %v698_v55  ;;  %v575_v2 = vsub.f32 %v319_v59, %v447_v63  ;;  %v321_v4 = vld [vmem:[%s1361_s19 + $0x390] sm:$0xff]  ;;  %v322_v9 = vld [vmem:[%s1361_s19 + $0x398] sm:$0xff] }
  0xb5   : > { %v701_v1 = vand.u32 2147483647, %v573_v56  ;;  %v448_v3 = vld [vmem:[%s1369_s29 + $0x388] sm:$0xff]  ;;  %v449_v5 = vld [vmem:[%s1369_s29 + $0x390] sm:$0xff]  ;;  %827 = vst [vmem:[%s1390_s20 + $0x360] sm:$0xff] %v699_v60  ;;  %v450_v10 = vld [vmem:[%s1369_s29 + $0x398] sm:$0xff] }
  0xb6   : > { %828 = vst [vmem:[%s1390_s20 + $0x368] sm:$0xff] %v700_v61  ;;  %v702_v6 = vand.u32 2147483647, %v574_v62  ;;  %v576_v7 = vsub.f32 %v320_v0, %v448_v3  ;;  %v577_v8 = vsub.f32 %v321_v4, %v449_v5  ;;  %v323_v11 = vld [vmem:[%s1361_s19 + $0x3a0] sm:$0xff]  ;;  %v703_v12 = vand.u32 2147483647, %v575_v2 }
  0xb7   : > { %829 = vst [vmem:[%s1390_s20 + $0x370] sm:$0xff] %v701_v1  ;;  %v578_v13 = vsub.f32 %v322_v9, %v450_v10  ;;  %v451_v14 = vld [vmem:[%s1369_s29 + $0x3a0] sm:$0xff]  ;;  %v324_v15 = vld [vmem:[%s1361_s19 + $0x3a8] sm:$0xff]  ;;  %v325_v21 = vld [vmem:[%s1361_s19 + $0x3b0] sm:$0xff] }
  0xb8   : > { %v452_v16 = vld [vmem:[%s1369_s29 + $0x3a8] sm:$0xff]  ;;  %830 = vst [vmem:[%s1390_s20 + $0x378] sm:$0xff] %v702_v6  ;;  %v704_v17 = vand.u32 2147483647, %v576_v7  ;;  %v705_v18 = vand.u32 2147483647, %v577_v8  ;;  %v579_v19 = vsub.f32 %v323_v11, %v451_v14 }
  0xb9   : > { %v580_v20 = vsub.f32 %v324_v15, %v452_v16  ;;  %v453_v22 = vld [vmem:[%s1369_s29 + $0x3b0] sm:$0xff]  ;;  %831 = vst [vmem:[%s1390_s20 + $0x380] sm:$0xff] %v703_v12  ;;  %v706_v23 = vand.u32 2147483647, %v578_v13  ;;  %v326_v25 = vld [vmem:[%s1361_s19 + $0x3b8] sm:$0xff]  ;;  %v327_v27 = vld [vmem:[%s1361_s19 + $0x3c0] sm:$0xff] }
  0xba   : > { %v581_v24 = vsub.f32 %v325_v21, %v453_v22  ;;  %v454_v26 = vld [vmem:[%s1369_s29 + $0x3b8] sm:$0xff]  ;;  %832 = vst [vmem:[%s1390_s20 + $0x388] sm:$0xff] %v704_v17  ;;  %833 = vst [vmem:[%s1390_s20 + $0x390] sm:$0xff] %v705_v18  ;;  %v707_v28 = vand.u32 2147483647, %v579_v19  ;;  %v455_v31 = vld [vmem:[%s1369_s29 + $0x3c0] sm:$0xff] }
  0xbb   : > { %v708_v29 = vand.u32 2147483647, %v580_v20  ;;  %v582_v30 = vsub.f32 %v326_v25, %v454_v26  ;;  %v328_v32 = vld [vmem:[%s1361_s19 + $0x3c8] sm:$0xff]  ;;  %834 = vst [vmem:[%s1390_s20 + $0x398] sm:$0xff] %v706_v23  ;;  %v583_v34 = vsub.f32 %v327_v27, %v455_v31  ;;  %v329_v36 = vld [vmem:[%s1361_s19 + $0x3d0] sm:$0xff]  ;;  %v330_v41 = vld [vmem:[%s1361_s19 + $0x3d8] sm:$0xff] }
  0xbc   : > { %v709_v33 = vand.u32 2147483647, %v581_v24  ;;  %v456_v35 = vld [vmem:[%s1369_s29 + $0x3c8] sm:$0xff]  ;;  %v457_v37 = vld [vmem:[%s1369_s29 + $0x3d0] sm:$0xff]  ;;  %835 = vst [vmem:[%s1390_s20 + $0x3a0] sm:$0xff] %v707_v28  ;;  %v458_v42 = vld [vmem:[%s1369_s29 + $0x3d8] sm:$0xff] }
  0xbd   : > { %836 = vst [vmem:[%s1390_s20 + $0x3a8] sm:$0xff] %v708_v29  ;;  %v710_v38 = vand.u32 2147483647, %v582_v30  ;;  %v584_v39 = vsub.f32 %v328_v32, %v456_v35  ;;  %v585_v40 = vsub.f32 %v329_v36, %v457_v37  ;;  %v331_v43 = vld [vmem:[%s1361_s19 + $0x3e0] sm:$0xff]  ;;  %v711_v44 = vand.u32 2147483647, %v583_v34 }
  0xbe   : > { %837 = vst [vmem:[%s1390_s20 + $0x3b0] sm:$0xff] %v709_v33  ;;  %v586_v45 = vsub.f32 %v330_v41, %v458_v42  ;;  %v459_v46 = vld [vmem:[%s1369_s29 + $0x3e0] sm:$0xff]  ;;  %v332_v47 = vld [vmem:[%s1361_s19 + $0x3e8] sm:$0xff]  ;;  %v333_v53 = vld [vmem:[%s1361_s19 + $0x3f0] sm:$0xff] }
  0xbf   : > { %v460_v48 = vld [vmem:[%s1369_s29 + $0x3e8] sm:$0xff]  ;;  %838 = vst [vmem:[%s1390_s20 + $0x3b8] sm:$0xff] %v710_v38  ;;  %v712_v49 = vand.u32 2147483647, %v584_v39  ;;  %v713_v50 = vand.u32 2147483647, %v585_v40  ;;  %v587_v51 = vsub.f32 %v331_v43, %v459_v46 }
  0xc0   : > { %v588_v52 = vsub.f32 %v332_v47, %v460_v48  ;;  %v461_v54 = vld [vmem:[%s1369_s29 + $0x3f0] sm:$0xff]  ;;  %839 = vst [vmem:[%s1390_s20 + $0x3c0] sm:$0xff] %v711_v44  ;;  %v714_v55 = vand.u32 2147483647, %v586_v45  ;;  %v334_v57 = vld [vmem:[%s1361_s19 + $0x3f8] sm:$0xff] }
  0xc1   : > { %v589_v56 = vsub.f32 %v333_v53, %v461_v54  ;;  %v462_v58 = vld [vmem:[%s1369_s29 + $0x3f8] sm:$0xff]  ;;  %840 = vst [vmem:[%s1390_s20 + $0x3c8] sm:$0xff] %v712_v49  ;;  %841 = vst [vmem:[%s1390_s20 + $0x3d0] sm:$0xff] %v713_v50  ;;  %v715_v59 = vand.u32 2147483647, %v587_v51 }
  0xc2   : > { %v716_v60 = vand.u32 2147483647, %v588_v52  ;;  %v590_v61 = vsub.f32 %v334_v57, %v462_v58  ;;  %842 = vst [vmem:[%s1390_s20 + $0x3d8] sm:$0xff] %v714_v55 }
  0xc3   : > { %v717_v62 = vand.u32 2147483647, %v589_v56  ;;  %843 = vst [vmem:[%s1390_s20 + $0x3e0] sm:$0xff] %v715_v59 }
  0xc4   : > { %844 = vst [vmem:[%s1390_s20 + $0x3e8] sm:$0xff] %v716_v60  ;;  %v718_v63 = vand.u32 2147483647, %v590_v61 }
  0xc5   : > { %845 = vst [vmem:[%s1390_s20 + $0x3f0] sm:$0xff] %v717_v62 }
  0xc6   : > { %846 = vst [vmem:[%s1390_s20 + $0x3f8] sm:$0xff] %v718_v63 }
  0xc7   : > { %1113 = shalt.err (!%p1110_p11)
}
  0xc8   : > { %s1114_s7 = scalar_lea.hbm %s1763_s17, 16384  ;;  %s1118_s4 = scalar_lea.hbm %s1815_s2, 32768 }
  0xc9   : > { %p1115_p3 = scmp.ne.s32.totalorder %s1763_s17, %s1114_s7  ;;  %p1119_p2 = scmp.lt.u32.totalorder %s1763_s17, %s1815_s2 }
  0xca   : > { %p1120_p4 = scmp.lt.u32.totalorder %s1118_s4, %s1114_s7  ;;  %p1122_p13 = scmp.lt.u32.totalorder %s1114_s7, %s1763_s17 }
  0xcb   : > { %p1116_p8 = pnand %p1115_p3, %p1825_p1 }
  0xcc   : > { %p1121_p6 = por %p1120_p4, %p1119_p2 }
  0xcd   : > { %p1117_p0 = pneg %p1116_p8 }
  0xce   : > { %p1123_p12 = por %p1122_p13, %p1121_p6 }
  0xd0   : > { %p1124_p10 = pnand %p1123_p12, %p1117_p0 }
  0xd2   : > { %1127 = shalt.err (!%p1124_p10)
}
  0xd3   : > { %s1177_s23 = smov 4096   ;;  %s1178_s29 = smov 256  }
  0xd4   : > { %989 = dma.vmem_to_hbm [thread:$0]  (%p1825_p1), %s1765_s6, 16384, %s1763_s17, %s848_s28, %s1177_s23, %s1177_s23, %s1178_s29  }
  0xd5 PF: > { %s877_s20 = sand.u32 1, %s1158_s9   ;;  %p1826_p5 = scmp.ne.s32.totalorder %s1821_s22, 0 }
  0xd6   : > { %p1827_p7 = scmp.ge.s32.totalorder %s1170_s12, 2  ;;  %s878_s5 = scalar_lea.sflag [#allocation4], %s877_s20 }
  0xd8   : > { %p999_p9 = pnand %p1827_p7, %p1826_p5 }
  0xda   : > { %1153 = dma.done.wait (!%p999_p9), %s878_s5, 16384  }
  0xdb   : > { %1155 = vsyncadd (!%p999_p9), %s878_s5, 4294950912  ;;  %p18_p11 = scmp.ge.s32.totalorder %s1219_s15, 4   ;;  %s1828_s9 = smov %s1162_s10 }
  0xdc   : > { %s1829_s10 = smov %s1166_s11  ;;  %s1830_s11 = smov %s1231_s18 }
  0xdd   : > { %s1831_s12 = smov %s1219_s15  ;;  %20 = sbr.rel (!%p18_p11) target bundleno = 7 (0x7), region = 86 }
  0xe4   :  { %883 = vsyncpa [#allocation3], 1 }
  0xe5   :  { %885 = vsyncpa [#allocation3 + $0x1], 1 }
  0xe6   :  { %886 = vsyncpa [#allocation6], 1 }
  0xe7   :  { %888 = vsyncpa [#allocation6 + $0x1], 1 }
  0xe8   :  { %889 = vsyncpa [#allocation4], 1 }
  0xe9   :  { %891 = vsyncpa [#allocation4 + $0x1], 1 }

</bundles_post_ra>
